<compile_context>
chip_gen: v6e
topology: v6e:2x2x1
jax: 0.10.0
libtpu: 0.0.40
codegen_flags: <defaults>
</compile_context>

<pallas_src>
import functools
from typing import NamedTuple

import jax
import jax.numpy as jnp
from jax.experimental import pallas as pl
from jax.experimental.pallas import tpu as pltpu


# ---------------------------------------------------------------------------
# Kernel
# ---------------------------------------------------------------------------
def _oracle_kernel(x_ref,
                   w0_ref, b0_ref,
                   w1_ref, b1_ref,
                   w2_ref, b2_ref,
                   wh_ref, bh_ref,
                   prob_ref, conf_ref, time_ref,
                   *, out_pad, out_size):
    """Fused 4-matmul MLP forward. bf16 operands, f32 MXU accumulation."""
    bf16 = jnp.bfloat16

    # f32 input block is DMA'd as-is; cast to bf16 on the VPU under the MXU.
    x = x_ref[...].astype(bf16)                                   # (bt, in)

    # input_projection: Linear only (no activation in the reference forward)
    h = jnp.dot(x, w0_ref[...], preferred_element_type=jnp.float32) + b0_ref[...]

    # hidden layer 1: Linear -> ReLU -> (Dropout = identity in eval mode)
    h = jnp.dot(h.astype(bf16), w1_ref[...],
                preferred_element_type=jnp.float32) + b1_ref[...]
    h = jnp.maximum(h, 0.0)

    # hidden layer 2: Linear -> ReLU -> (Dropout = identity in eval mode)
    h = jnp.dot(h.astype(bf16), w2_ref[...],
                preferred_element_type=jnp.float32) + b2_ref[...]
    h = jnp.maximum(h, 0.0)

    # three heads fused into a single lane-padded matmul (each head occupies a
    # 128-lane-aligned column slab of the fused weight):
    #   [:,          :  out_pad] -> probability logits
    #   [:,   out_pad:2*out_pad] -> confidence  logits
    #   [:, 2*out_pad:         ] -> timeline    logits
    logits = jnp.dot(h.astype(bf16), wh_ref[...],
                     preferred_element_type=jnp.float32) + bh_ref[...]

    def sigmoid_eup(v):
        # exp + approximate reciprocal both run on the EUP slot (VALU stays free).
        return pl.reciprocal(1.0 + jnp.exp(-v), approx=True)

    prob_ref[...] = sigmoid_eup(logits[:, :out_size]).astype(prob_ref.dtype)
    conf_ref[...] = sigmoid_eup(
        logits[:, out_pad:out_pad + out_size]).astype(conf_ref.dtype)
    time_ref[...] = jnp.tanh(
        logits[:, 2 * out_pad:2 * out_pad + out_size]).astype(time_ref.dtype)


# ---------------------------------------------------------------------------
# One-time parameter preparation (hoisted out of the per-call path)
# ---------------------------------------------------------------------------
class OraclePreparedParams(NamedTuple):
    w0: jax.Array
    b0: jax.Array
    w1: jax.Array
    b1: jax.Array
    w2: jax.Array
    b2: jax.Array
    wh: jax.Array   # fused, lane-padded (H2, 3*out_pad) head weight
    bh: jax.Array   # fused, lane-padded (1, 3*out_pad) head bias


def prepare_params(params, weight_dtype=jnp.bfloat16):
    """One-time: cast weights to bf16 and fuse+lane-pad the three heads.

    Returns (prepared, out_size). Call once, reuse across forwards.
    """
    (w0, b0), (w1, b1), (w2, b2), (wp, bp), (wc, bc), (wt, bt) = params
    h2, out_size = wp.shape
    out_pad = ((out_size + 127) // 128) * 128      # lane-pad each head to 128s

    def pad_head(w, b):
        w_p = jnp.zeros((h2, out_pad), w.dtype).at[:, :out_size].set(w)
        b_p = jnp.zeros((1, out_pad), b.dtype).at[:, :out_size].set(b)
        return w_p, b_p

    wp_p, bp_p = pad_head(wp, bp)
    wc_p, bc_p = pad_head(wc, bc)
    wt_p, bt_p = pad_head(wt, bt)
    wh = jnp.concatenate([wp_p, wc_p, wt_p], axis=1)
    bh = jnp.concatenate([bp_p, bc_p, bt_p], axis=1)

    f32 = jnp.float32
    prepared = OraclePreparedParams(
        w0=w0.astype(weight_dtype), b0=b0.astype(f32),
        w1=w1.astype(weight_dtype), b1=b1.astype(f32),
        w2=w2.astype(weight_dtype), b2=b2.astype(f32),
        wh=wh.astype(weight_dtype), bh=bh.astype(f32))
    return prepared, out_size


# ---------------------------------------------------------------------------
# Batch tiling
# ---------------------------------------------------------------------------
def _pick_batch_tile(batch):
    """MXU/pipeline-sized batch tile.

    * B <= 128: one grid step, whole batch as one block (latency path).
    * B  > 128: largest 128..1024-row tile that still yields >= 2 grid steps,
      so the ("parallel",) grid axis can shard across v7x's two TensorCores
      and large batches approach the HBM roofline. All tiles are multiples of
      16 (bf16 sublane packing). Non-divisible B is handled by padding in the
      wrapper (cdiv grid), never by a single giant block.
    """
    if batch <= 128:
        return batch
    for tile in (1024, 512, 256, 128):
        if batch >= 2 * tile:
            return tile
    return 128


# ---------------------------------------------------------------------------
# Forward wrapper
# ---------------------------------------------------------------------------
def oracle_forward(x, prepared, out_size, *, batch_tile=None,
                   out_dtype=jnp.float32):
    """Oracle MLP forward pass as one Pallas TPU kernel.

    x: (B, input_size) float32. `prepared` is from prepare_params(). Returns
    (probabilities, confidence, timeline), each (B, out_size) in `out_dtype`
    (use out_dtype=jnp.bfloat16 to halve output writeback for large batches).
    """
    B, in_size = x.shape
    h2 = prepared.wh.shape[0]
    out_pad = prepared.wh.shape[1] // 3
    h0 = prepared.w0.shape[1]
    h1 = prepared.w1.shape[1]

    if batch_tile is None:
        batch_tile = _pick_batch_tile(B)

    n_steps = pl.cdiv(B, batch_tile)
    b_pad = n_steps * batch_tile
    x_in = x if b_pad == B else jnp.pad(x, ((0, b_pad - B), (0, 0)))

    grid = (n_steps,)

    def batch_map(i):
        return (i, 0)

    def rep_map(i):
        return (0, 0)

    weight_args = [prepared.w0, prepared.b0, prepared.w1, prepared.b1,
                   prepared.w2, prepared.b2, prepared.wh, prepared.bh]
    in_specs = [pl.BlockSpec((batch_tile, in_size), batch_map)]
    in_specs += [pl.BlockSpec(w.shape, rep_map) for w in weight_args]

    # Three separate outputs; block last dim == full array dim (no post-kernel
    # slicing of a padded slab).
    out_specs = tuple(pl.BlockSpec((batch_tile, out_size), batch_map)
                      for _ in range(3))
    out_shapes = tuple(jax.ShapeDtypeStruct((b_pad, out_size), out_dtype)
                       for _ in range(3))

    # Advisory cost estimate (flops / transcendentals / HBM bytes).
    flops = 2 * b_pad * (in_size * h0 + h0 * h1 + h1 * h2 + h2 * 3 * out_pad)
    bytes_accessed = (
        int(x_in.size) * x_in.dtype.itemsize
        + sum(int(a.size) * a.dtype.itemsize for a in weight_args)
        + 3 * b_pad * out_size * jnp.dtype(out_dtype).itemsize)
    transcendentals = 3 * b_pad * 3 * out_size   # exp + rcp (x2 heads) + tanh

    fn = pl.pallas_call(
        functools.partial(_oracle_kernel, out_pad=out_pad, out_size=out_size),
        grid=grid,
        in_specs=in_specs,
        out_specs=out_specs,
        out_shape=out_shapes,
        compiler_params=pltpu.CompilerParams(
            dimension_semantics=("parallel",)),
        cost_estimate=pl.CostEstimate(
            flops=flops,
            transcendentals=transcendentals,
            bytes_accessed=bytes_accessed),
    )
    prob, conf, timeline = fn(x_in, *weight_args)

    if b_pad != B:   # only for batches not divisible by the tile
        prob, conf, timeline = prob[:B], conf[:B], timeline[:B]
    return prob, conf, timeline


# ---------------------------------------------------------------------------
# Synthetic params + pure-JAX references
# ---------------------------------------------------------------------------
def init_params(key, input_size, hidden_sizes, output_size):
    """Deterministic synthetic parameters. Weights stored (in, out); bias (1, out)."""
    dims = [input_size] + list(hidden_sizes)
    params = []
    keys = jax.random.split(key, 2 * (len(dims) - 1 + 3))
    k_idx = 0
    for i in range(len(dims) - 1):
        fan_in = dims[i]
        w = jax.random.normal(keys[k_idx], (dims[i], dims[i + 1]), jnp.float32)
        w = w * (1.0 / jnp.sqrt(jnp.float32(fan_in)))
        b = 0.1 * jax.random.normal(keys[k_idx + 1], (1, dims[i + 1]), jnp.float32)
        params.append((w, b))
        k_idx += 2
    for _ in range(3):
        fan_in = hidden_sizes[-1]
        w = jax.random.normal(keys[k_idx], (hidden_sizes[-1], output_size), jnp.float32)
        w = w * (1.0 / jnp.sqrt(jnp.float32(fan_in)))
        b = 0.1 * jax.random.normal(keys[k_idx + 1], (1, output_size), jnp.float32)
        params.append((w, b))
        k_idx += 2
    return params


def oracle_reference_f32(x, params):
    """Pure-JAX f32 reference (exact module semantics)."""
    (w0, b0), (w1, b1), (w2, b2), (wp, bp), (wc, bc), (wt, bt) = params
    h = x @ w0 + b0
    h = jnp.maximum(h @ w1 + b1, 0.0)
    h = jnp.maximum(h @ w2 + b2, 0.0)
    return (jax.nn.sigmoid(h @ wp + bp),
            jax.nn.sigmoid(h @ wc + bc),
            jnp.tanh(h @ wt + bt))


def oracle_reference_bf16(x, params):
    """Pure-JAX reference mirroring the kernel's bf16-operand / f32-accumulate math."""
    (w0, b0), (w1, b1), (w2, b2), (wp, bp), (wc, bc), (wt, bt) = params
    bf = jnp.bfloat16

    def mm(a, w):
        return jnp.dot(a.astype(bf), w.astype(bf),
                       preferred_element_type=jnp.float32)

    h = mm(x, w0) + b0
    h = jnp.maximum(mm(h, w1) + b1, 0.0)
    h = jnp.maximum(mm(h, w2) + b2, 0.0)
    return (jax.nn.sigmoid(mm(h, wp) + bp),
            jax.nn.sigmoid(mm(h, wc) + bc),
            jnp.tanh(mm(h, wt) + bt))


if __name__ == "__main__":
    # Small, module-consistent shapes: batch=8, input_size=64,
    # hidden_sizes=[512, 256, 128] (module defaults), output_size=100.
    input_size = 64
    hidden_sizes = [512, 256, 128]
    output_size = 100
    batch = 8

    key = jax.random.PRNGKey(0)
    k_x, k_p = jax.random.split(key)
    x = jax.random.normal(k_x, (batch, input_size), jnp.float32)
    params = init_params(k_p, input_size, hidden_sizes, output_size)

    # One-time weight preparation (hoisted out of the per-forward path).
    prepared, out_size = prepare_params(params)
    jax.block_until_ready(prepared)

    prob, conf, timeline = oracle_forward(x, prepared, out_size)
    jax.block_until_ready((prob, conf, timeline))

    assert prob.shape == (batch, output_size)
    assert conf.shape == (batch, output_size)
    assert timeline.shape == (batch, output_size)

    # Check against a reference mirroring the kernel's bf16/f32 math
    # (tolerance covers the EUP approximate reciprocal in sigmoid).
    mb_prob, mb_conf, mb_time = oracle_reference_bf16(x, params)
    assert jnp.allclose(prob, mb_prob, atol=5e-3, rtol=5e-3)
    assert jnp.allclose(conf, mb_conf, atol=5e-3, rtol=5e-3)
    assert jnp.allclose(timeline, mb_time, atol=5e-3, rtol=5e-3)

    # Loose check against the exact f32 module semantics (bf16 quantization error).
    f_prob, f_conf, f_time = oracle_reference_f32(x, params)
    assert jnp.allclose(prob, f_prob, atol=5e-2, rtol=5e-2)
    assert jnp.allclose(conf, f_conf, atol=5e-2, rtol=5e-2)
    assert jnp.allclose(timeline, f_time, atol=5e-2, rtol=5e-2)

    print("KERNEL_OK")
</pallas_src>

<mosaic_0001>
module attributes {stable_mosaic.version = 11 : i64} {
  func.func @_oracle_kernel(%arg0: i32, %arg1: memref<8x64xf32, #tpu.memory_space<vmem>>, %arg2: memref<64x512xbf16, #tpu.memory_space<vmem>>, %arg3: memref<1x512xf32, #tpu.memory_space<vmem>>, %arg4: memref<512x256xbf16, #tpu.memory_space<vmem>>, %arg5: memref<1x256xf32, #tpu.memory_space<vmem>>, %arg6: memref<256x128xbf16, #tpu.memory_space<vmem>>, %arg7: memref<1x128xf32, #tpu.memory_space<vmem>>, %arg8: memref<128x384xbf16, #tpu.memory_space<vmem>>, %arg9: memref<1x384xf32, #tpu.memory_space<vmem>>, %arg10: memref<8x100xf32, #tpu.memory_space<vmem>>, %arg11: memref<8x100xf32, #tpu.memory_space<vmem>>, %arg12: memref<8x100xf32, #tpu.memory_space<vmem>>) attributes {dimension_semantics = [#tpu.dimension_semantics<parallel>], iteration_bounds = array<i64: 1>, scalar_prefetch = 0 : i64, scratch_operands = 0 : i64, tpu.core_type = #tpu.core_type<tc>, window_params = [{transform_indices = @transform_0, window_bounds = array<i64: 8, 64>}, {pipeline_mode = #tpu.pipeline_mode<synchronous>, transform_indices = @transform_1, window_bounds = array<i64: 64, 512>}, {pipeline_mode = #tpu.pipeline_mode<synchronous>, transform_indices = @transform_2, window_bounds = array<i64: 1, 512>}, {pipeline_mode = #tpu.pipeline_mode<synchronous>, transform_indices = @transform_3, window_bounds = array<i64: 512, 256>}, {pipeline_mode = #tpu.pipeline_mode<synchronous>, transform_indices = @transform_4, window_bounds = array<i64: 1, 256>}, {pipeline_mode = #tpu.pipeline_mode<synchronous>, transform_indices = @transform_5, window_bounds = array<i64: 256, 128>}, {pipeline_mode = #tpu.pipeline_mode<synchronous>, transform_indices = @transform_6, window_bounds = array<i64: 1, 128>}, {pipeline_mode = #tpu.pipeline_mode<synchronous>, transform_indices = @transform_7, window_bounds = array<i64: 128, 384>}, {pipeline_mode = #tpu.pipeline_mode<synchronous>, transform_indices = @transform_8, window_bounds = array<i64: 1, 384>}, {transform_indices = @transform_9, window_bounds = array<i64: 8, 100>}, {transform_indices = @transform_10, window_bounds = array<i64: 8, 100>}, {transform_indices = @transform_11, window_bounds = array<i64: 8, 100>}]} {
    %c0 = arith.constant 0 : index
    %c0_0 = arith.constant 0 : index
    %0 = vector.load %arg1[%c0, %c0_0] : memref<8x64xf32, #tpu.memory_space<vmem>>, vector<8x64xf32>
    %1 = arith.truncf %0 : vector<8x64xf32> to vector<8x64xbf16>
    %c0_1 = arith.constant 0 : index
    %c0_2 = arith.constant 0 : index
    %2 = vector.load %arg2[%c0_1, %c0_2] : memref<64x512xbf16, #tpu.memory_space<vmem>>, vector<64x512xbf16>
    %cst = arith.constant dense<0.000000e+00> : vector<8x512xf32>
    %3 = tpu.matmul %1, %2, %cst {dimension_numbers = #tpu.dot_dimension_numbers<[1], [0], [0], [1], [0, 0, 1, 1], [], []>} : vector<8x64xbf16>, vector<64x512xbf16>, vector<8x512xf32> -> vector<8x512xf32>
    %c0_3 = arith.constant 0 : index
    %c0_4 = arith.constant 0 : index
    %4 = vector.load %arg3[%c0_3, %c0_4] : memref<1x512xf32, #tpu.memory_space<vmem>>, vector<1x512xf32>
    %5 = vector.broadcast %4 : vector<1x512xf32> to vector<8x512xf32>
    %6 = arith.addf %3, %5 : vector<8x512xf32>
    %7 = arith.truncf %6 : vector<8x512xf32> to vector<8x512xbf16>
    %c0_5 = arith.constant 0 : index
    %c0_6 = arith.constant 0 : index
    %8 = vector.load %arg4[%c0_5, %c0_6] : memref<512x256xbf16, #tpu.memory_space<vmem>>, vector<512x256xbf16>
    %cst_7 = arith.constant dense<0.000000e+00> : vector<8x256xf32>
    %9 = tpu.matmul %7, %8, %cst_7 {dimension_numbers = #tpu.dot_dimension_numbers<[1], [0], [0], [1], [0, 0, 1, 1], [], []>} : vector<8x512xbf16>, vector<512x256xbf16>, vector<8x256xf32> -> vector<8x256xf32>
    %c0_8 = arith.constant 0 : index
    %c0_9 = arith.constant 0 : index
    %10 = vector.load %arg5[%c0_8, %c0_9] : memref<1x256xf32, #tpu.memory_space<vmem>>, vector<1x256xf32>
    %11 = vector.broadcast %10 : vector<1x256xf32> to vector<8x256xf32>
    %12 = arith.addf %9, %11 : vector<8x256xf32>
    %cst_10 = arith.constant 0.000000e+00 : f32
    %13 = vector.broadcast %cst_10 : f32 to vector<8x256xf32>
    %14 = arith.maximumf %12, %13 : vector<8x256xf32>
    %15 = arith.truncf %14 : vector<8x256xf32> to vector<8x256xbf16>
    %c0_11 = arith.constant 0 : index
    %c0_12 = arith.constant 0 : index
    %16 = vector.load %arg6[%c0_11, %c0_12] : memref<256x128xbf16, #tpu.memory_space<vmem>>, vector<256x128xbf16>
    %cst_13 = arith.constant dense<0.000000e+00> : vector<8x128xf32>
    %17 = tpu.matmul %15, %16, %cst_13 {dimension_numbers = #tpu.dot_dimension_numbers<[1], [0], [0], [1], [0, 0, 1, 1], [], []>} : vector<8x256xbf16>, vector<256x128xbf16>, vector<8x128xf32> -> vector<8x128xf32>
    %c0_14 = arith.constant 0 : index
    %c0_15 = arith.constant 0 : index
    %18 = vector.load %arg7[%c0_14, %c0_15] : memref<1x128xf32, #tpu.memory_space<vmem>>, vector<1x128xf32>
    %19 = vector.broadcast %18 : vector<1x128xf32> to vector<8x128xf32>
    %20 = arith.addf %17, %19 : vector<8x128xf32>
    %cst_16 = arith.constant 0.000000e+00 : f32
    %21 = vector.broadcast %cst_16 : f32 to vector<8x128xf32>
    %22 = arith.maximumf %20, %21 : vector<8x128xf32>
    %23 = arith.truncf %22 : vector<8x128xf32> to vector<8x128xbf16>
    %c0_17 = arith.constant 0 : index
    %c0_18 = arith.constant 0 : index
    %24 = vector.load %arg8[%c0_17, %c0_18] : memref<128x384xbf16, #tpu.memory_space<vmem>>, vector<128x384xbf16>
    %cst_19 = arith.constant dense<0.000000e+00> : vector<8x384xf32>
    %25 = tpu.matmul %23, %24, %cst_19 {dimension_numbers = #tpu.dot_dimension_numbers<[1], [0], [0], [1], [0, 0, 1, 1], [], []>} : vector<8x128xbf16>, vector<128x384xbf16>, vector<8x384xf32> -> vector<8x384xf32>
    %c0_20 = arith.constant 0 : index
    %c0_21 = arith.constant 0 : index
    %26 = vector.load %arg9[%c0_20, %c0_21] : memref<1x384xf32, #tpu.memory_space<vmem>>, vector<1x384xf32>
    %27 = vector.broadcast %26 : vector<1x384xf32> to vector<8x384xf32>
    %28 = arith.addf %25, %27 : vector<8x384xf32>
    %29 = vector.extract_strided_slice %28 {offsets = [0, 0], sizes = [8, 100], strides = [1, 1]} : vector<8x384xf32> to vector<8x100xf32>
    %cst_22 = arith.constant 0.000000e+00 : f32
    %30 = vector.broadcast %cst_22 : f32 to vector<8x100xf32>
    %31 = arith.subf %30, %29 : vector<8x100xf32>
    %32 = math.exp %31 : vector<8x100xf32>
    %cst_23 = arith.constant 1.000000e+00 : f32
    %33 = vector.broadcast %cst_23 : f32 to vector<8x100xf32>
    %34 = arith.addf %33, %32 : vector<8x100xf32>
    %35 = tpu.reciprocal %34 {approx = true} : vector<8x100xf32> -> vector<8x100xf32>
    %c0_24 = arith.constant 0 : index
    %c0_25 = arith.constant 0 : index
    %36 = vector.load %arg10[%c0_24, %c0_25] : memref<8x100xf32, #tpu.memory_space<vmem>>, vector<8x100xf32>
    tpu.vector_store %arg10[%c0_24, %c0_25], %35 {strides = array<i32>} : memref<8x100xf32, #tpu.memory_space<vmem>>, vector<8x100xf32>,
    %37 = vector.extract_strided_slice %28 {offsets = [0, 128], sizes = [8, 100], strides = [1, 1]} : vector<8x384xf32> to vector<8x100xf32>
    %cst_26 = arith.constant 0.000000e+00 : f32
    %38 = vector.broadcast %cst_26 : f32 to vector<8x100xf32>
    %39 = arith.subf %38, %37 : vector<8x100xf32>
    %40 = math.exp %39 : vector<8x100xf32>
    %cst_27 = arith.constant 1.000000e+00 : f32
    %41 = vector.broadcast %cst_27 : f32 to vector<8x100xf32>
    %42 = arith.addf %41, %40 : vector<8x100xf32>
    %43 = tpu.reciprocal %42 {approx = true} : vector<8x100xf32> -> vector<8x100xf32>
    %c0_28 = arith.constant 0 : index
    %c0_29 = arith.constant 0 : index
    %44 = vector.load %arg11[%c0_28, %c0_29] : memref<8x100xf32, #tpu.memory_space<vmem>>, vector<8x100xf32>
    tpu.vector_store %arg11[%c0_28, %c0_29], %43 {strides = array<i32>} : memref<8x100xf32, #tpu.memory_space<vmem>>, vector<8x100xf32>,
    %45 = vector.extract_strided_slice %28 {offsets = [0, 256], sizes = [8, 100], strides = [1, 1]} : vector<8x384xf32> to vector<8x100xf32>
    %46 = math.tanh %45 : vector<8x100xf32>
    %c0_30 = arith.constant 0 : index
    %c0_31 = arith.constant 0 : index
    %47 = vector.load %arg12[%c0_30, %c0_31] : memref<8x100xf32, #tpu.memory_space<vmem>>, vector<8x100xf32>
    tpu.vector_store %arg12[%c0_30, %c0_31], %46 {strides = array<i32>} : memref<8x100xf32, #tpu.memory_space<vmem>>, vector<8x100xf32>,
    return
  }
  func.func @transform_0(%arg0: i32) -> (i32, i32) {
    %c0_i32 = arith.constant 0 : i32
    %c0_i32_0 = arith.constant 0 : i32
    return %arg0, %c0_i32 : i32, i32
  }
  func.func @transform_1(%arg0: i32) -> (i32, i32) {
    %c0_i32 = arith.constant 0 : i32
    %c0_i32_0 = arith.constant 0 : i32
    %c0_i32_1 = arith.constant 0 : i32
    return %c0_i32, %c0_i32_0 : i32, i32
  }
  func.func @transform_2(%arg0: i32) -> (i32, i32) {
    %c0_i32 = arith.constant 0 : i32
    %c0_i32_0 = arith.constant 0 : i32
    %c0_i32_1 = arith.constant 0 : i32
    return %c0_i32, %c0_i32_0 : i32, i32
  }
  func.func @transform_3(%arg0: i32) -> (i32, i32) {
    %c0_i32 = arith.constant 0 : i32
    %c0_i32_0 = arith.constant 0 : i32
    %c0_i32_1 = arith.constant 0 : i32
    return %c0_i32, %c0_i32_0 : i32, i32
  }
  func.func @transform_4(%arg0: i32) -> (i32, i32) {
    %c0_i32 = arith.constant 0 : i32
    %c0_i32_0 = arith.constant 0 : i32
    %c0_i32_1 = arith.constant 0 : i32
    return %c0_i32, %c0_i32_0 : i32, i32
  }
  func.func @transform_5(%arg0: i32) -> (i32, i32) {
    %c0_i32 = arith.constant 0 : i32
    %c0_i32_0 = arith.constant 0 : i32
    %c0_i32_1 = arith.constant 0 : i32
    return %c0_i32, %c0_i32_0 : i32, i32
  }
  func.func @transform_6(%arg0: i32) -> (i32, i32) {
    %c0_i32 = arith.constant 0 : i32
    %c0_i32_0 = arith.constant 0 : i32
    %c0_i32_1 = arith.constant 0 : i32
    return %c0_i32, %c0_i32_0 : i32, i32
  }
  func.func @transform_7(%arg0: i32) -> (i32, i32) {
    %c0_i32 = arith.constant 0 : i32
    %c0_i32_0 = arith.constant 0 : i32
    %c0_i32_1 = arith.constant 0 : i32
    return %c0_i32, %c0_i32_0 : i32, i32
  }
  func.func @transform_8(%arg0: i32) -> (i32, i32) {
    %c0_i32 = arith.constant 0 : i32
    %c0_i32_0 = arith.constant 0 : i32
    %c0_i32_1 = arith.constant 0 : i32
    return %c0_i32, %c0_i32_0 : i32, i32
  }
  func.func @transform_9(%arg0: i32) -> (i32, i32) {
    %c0_i32 = arith.constant 0 : i32
    %c0_i32_0 = arith.constant 0 : i32
    return %arg0, %c0_i32 : i32, i32
  }
  func.func @transform_10(%arg0: i32) -> (i32, i32) {
    %c0_i32 = arith.constant 0 : i32
    %c0_i32_0 = arith.constant 0 : i32
    return %arg0, %c0_i32 : i32, i32
  }
  func.func @transform_11(%arg0: i32) -> (i32, i32) {
    %c0_i32 = arith.constant 0 : i32
    %c0_i32_0 = arith.constant 0 : i32
    return %arg0, %c0_i32 : i32, i32
  }
}

</mosaic_0001>

<bundles_post_ra>
// kernel: tpu_custom_call.1
= control target key start
LH: loop header
LB: loop body
LE: loop exit
PB: predicated region body
PF: predicated region fallthrough
CT: control target
= control target key end

     0   :  { %17 = vsyncpa [#allocation3], 0  ;;  %s2020_s0 = inlined_call_operand.hbm [shape: f32[8,64], index: 0, kind: input, shape index: {}]   ;;  %s2021_s1 = inlined_call_operand.hbm [shape: bf16[64,512], index: 1, kind: input, shape index: {}]   ;;  %s2022_s2 = inlined_call_operand.hbm [shape: f32[1,512], index: 2, kind: input, shape index: {}]   ;;  %s2023_s3 = inlined_call_operand.hbm [shape: bf16[512,256], index: 3, kind: input, shape index: {}]   ;;  %s2024_s4 = inlined_call_operand.vmem [shape: f32[1,256], index: 4, kind: input, shape index: {}]   ;;  %s2025_s5 = inlined_call_operand.hbm [shape: bf16[256,128], index: 5, kind: input, shape index: {}]   ;;  %s2026_s6 = inlined_call_operand.vmem [shape: f32[1,128], index: 6, kind: input, shape index: {}]   ;;  %s2027_s7 = inlined_call_operand.hbm [shape: bf16[128,384], index: 7, kind: input, shape index: {}]   ;;  %s2028_s8 = inlined_call_operand.vmem [shape: f32[1,384], index: 8, kind: input, shape index: {}]   ;;  %s2029_s9 = inlined_call_operand.hbm [shape: f32[8,100], index: 9, kind: output, shape index: {0}]   ;;  %s2030_s10 = inlined_call_operand.hbm [shape: f32[8,100], index: 10, kind: output, shape index: {1}]   ;;  %s2031_s11 = inlined_call_operand.hbm [shape: f32[8,100], index: 11, kind: output, shape index: {2}]  }
   0x1   :  { %18 = vsyncpa [#allocation6], 0 }
   0x2   :  { %19 = vsyncpa [#allocation9], 0 }
   0x3   :  { %20 = vsyncpa [#allocation12], 0 }
   0x4   :  { %21 = vsyncpa [#allocation4], 0 }
   0x5   :  { %22 = vsyncpa [#allocation15], 0  ;;  %s1867_s17 = smov [#allocation5]  }
   0x6   :  { %s38_s18 = sshll.u32 %s1867_s17, 4  ;;  %s39_s18 = int_to_ptr.vmem [resolvable:$true] %s38_s18 }
   0x7   :  { %s1683_s19 = scalar_lea.vmem %s39_s18, 2048  ;;  %p1688_p1 = scmp.lt.s32.totalorder %s39_s18, %s39_s18 }
   0x8   :  { %p1684_p0 = scmp.ne.s32.totalorder %s39_s18, %s1683_s19  ;;  %p1689_p2 = scmp.lt.s32.totalorder %s1683_s19, %s1683_s19 }
   0xa   :  { %p1690_p3 = por %p1689_p2, %p1688_p1 }
   0xc   :  { %p1691_p4 = pnand %p1690_p3, %p1684_p0 }
   0xe   :  { %1694 = shalt.err (!%p1691_p4)
}
   0xf   :  { %s1868_s20 = smov 256   ;;  %s1869_s21 = smov 16  }
  0x10   :  { %44 = dma.hbm_to_vmem [thread:$0]  %s2021_s1, 2048, %s39_s18, [#allocation6], %s1868_s20, %s1868_s20, %s1869_s21  }
  0x11   :  { %s1870_s24 = smov [#allocation8]  }
  0x12   :  { %s60_s25 = sshll.u32 %s1870_s24, 4  ;;  %s61_s25 = int_to_ptr.vmem [resolvable:$true] %s60_s25 }
  0x13   :  { %s1703_s26 = scalar_lea.vmem %s61_s25, 8192  ;;  %p1708_p6 = scmp.lt.s32.totalorder %s61_s25, %s61_s25 }
  0x14   :  { %p1704_p5 = scmp.ne.s32.totalorder %s61_s25, %s1703_s26  ;;  %p1709_p7 = scmp.lt.s32.totalorder %s1703_s26, %s1703_s26 }
  0x16   :  { %p1710_p8 = por %p1709_p7, %p1708_p6 }
  0x18   :  { %p1711_p9 = pnand %p1710_p8, %p1704_p5 }
  0x1a   :  { %1714 = shalt.err (!%p1711_p9)
}
  0x1b   :  { %s1871_s27 = smov 128   ;;  %s1872_s28 = smov 8  }
  0x1c   :  { %66 = dma.hbm_to_vmem [thread:$0]  %s2023_s3, 8192, %s61_s25, [#allocation9], %s1871_s27, %s1871_s27, %s1872_s28  }
  0x1d   :  { %s1873_s12 = smov [#allocation2]   ;;  %s1874_s14 = smov [#allocation7]  }
  0x1e   :  { %s29_s13 = sshll.u32 %s1873_s12, 4  ;;  %s51_s1 = sshll.u32 %s1874_s14, 4  ;;  %s30_s13 = int_to_ptr.vmem [resolvable:$true] %s29_s13  ;;  %s52_s1 = int_to_ptr.vmem [resolvable:$true] %s51_s1 }
  0x1f   :  { %s1723_s15 = scalar_lea.vmem %s30_s13, 128  ;;  %p1728_p11 = scmp.lt.s32.totalorder %s30_s13, %s30_s13 }
  0x20   :  { %p1724_p10 = scmp.ne.s32.totalorder %s30_s13, %s1723_s15  ;;  %p1729_p12 = scmp.lt.s32.totalorder %s1723_s15, %s1723_s15 }
  0x22   :  { %p1730_p13 = por %p1729_p12, %p1728_p11 }
  0x24   :  { %p1731_p0 = pnand %p1730_p13, %p1724_p10 }
  0x26   :  { %1734 = shalt.err (!%p1731_p0)
}
  0x27   :  { %32 = dma.hbm_to_vmem [thread:$0]  %s2020_s0, 128, %s30_s13, [#allocation3]  }
  0x28   :  { %s1743_s18 = scalar_lea.vmem %s52_s1, 64  ;;  %p1748_p2 = scmp.lt.s32.totalorder %s52_s1, %s52_s1 }
  0x29   :  { %p1744_p1 = scmp.ne.s32.totalorder %s52_s1, %s1743_s18  ;;  %p1749_p3 = scmp.lt.s32.totalorder %s1743_s18, %s1743_s18 }
  0x2b   :  { %p1750_p4 = por %p1749_p3, %p1748_p2 }
  0x2d   :  { %p1751_p5 = pnand %p1750_p4, %p1744_p1 }
  0x2f   :  { %1754 = shalt.err (!%p1751_p5)
}
  0x30   :  { %54 = dma.hbm_to_vmem [thread:$0]  %s2022_s2, 64, %s52_s1, [#allocation6]  }
  0x31   :  { %s1875_s20 = smov [#allocation10]  }
  0x32   :  { %s74_s21 = sshll.u32 %s1875_s20, 4  ;;  %s75_s21 = int_to_ptr.vmem [resolvable:$true] %s74_s21 }
  0x33   :  { %s1763_s22 = scalar_lea.vmem %s75_s21, 2048  ;;  %p1768_p7 = scmp.lt.s32.totalorder %s75_s21, %s75_s21 }
  0x34   :  { %p1764_p6 = scmp.ne.s32.totalorder %s75_s21, %s1763_s22  ;;  %p1769_p8 = scmp.lt.s32.totalorder %s1763_s22, %s1763_s22 }
  0x36   :  { %p1770_p9 = por %p1769_p8, %p1768_p7 }
  0x38   :  { %p1771_p10 = pnand %p1770_p9, %p1764_p6 }
  0x3a   :  { %1774 = shalt.err (!%p1771_p10)
}
  0x3b   :  { %s1876_s0 = smov 64   ;;  %s1877_s23 = smov 4  }
  0x3c   :  { %80 = dma.hbm_to_vmem [thread:$0]  %s2025_s5, 2048, %s75_s21, [#allocation9], %s1876_s0, %s1876_s0, %s1877_s23  }
  0x3d   :  { %s1878_s26 = smov [#allocation11]  }
  0x3e   :  { %s88_s27 = sshll.u32 %s1878_s26, 4  ;;  %s89_s27 = int_to_ptr.vmem [resolvable:$true] %s88_s27 }
  0x3f   :  { %s1783_s2 = scalar_lea.vmem %s89_s27, 3072  ;;  %p1788_p12 = scmp.lt.s32.totalorder %s89_s27, %s89_s27 }
  0x40   :  { %p1784_p11 = scmp.ne.s32.totalorder %s89_s27, %s1783_s2  ;;  %p1789_p13 = scmp.lt.s32.totalorder %s1783_s2, %s1783_s2 }
  0x42   :  { %p1790_p0 = por %p1789_p13, %p1788_p12 }
  0x44   :  { %p1791_p1 = pnand %p1790_p0, %p1784_p11 }
  0x46   :  { %1794 = shalt.err (!%p1791_p1)
}
  0x47   :  { %s1879_s28 = smov 192   ;;  %s1880_s29 = smov 12  }
  0x48   :  { %94 = dma.hbm_to_vmem [thread:$0]  %s2027_s7, 3072, %s89_s27, [#allocation12], %s1879_s28, %s1879_s28, %s1880_s29  }
  0x49   :  { %1855 = dma.done.wait [#allocation3], 128  }
  0x4a   :  { %1856 = vsyncadd [#allocation3], 4294967168 }
  0x4b   :  { %1857 = dma.done.wait [#allocation6], 2112  }
  0x4c   :  { %1858 = vsyncadd [#allocation6], 4294965184 }
  0x4d   :  { %1859 = dma.done.wait [#allocation9], 10240  }
  0x4e   :  { %1860 = vsyncadd [#allocation9], 4294957056 }
  0x4f   :  { %1861 = dma.done.wait [#allocation12], 3072  }
  0x50   :  { %1862 = vsyncadd [#allocation12], 4294964224  ;;  %v1881_v0 = vmov 0   ;;  %v1497_v1 = vld [vmem:[#allocation5 + $0x64] ss:$16 sps:$4 sm:$0xff]   ;;  %v116_v9 = vld [vmem:[#allocation2] sm:$0xff] }
  0x51   :  { %272 = vmatprep.mubr.bf16.mxu1 %v1881_v0  ;;  %v1499_v2 = vld [vmem:[#allocation5 + $0x60] ss:$16 sps:$4 sm:$0xff]   ;;  %248 = vmatprep.subr.bf16.mxu1 %v1497_v1  ;;  %v1500_v3 = vld [vmem:[#allocation5 + $0x44] ss:$16 sps:$4 sm:$0xff]   ;;  %v1511_v10 = vld [vmem:[#allocation5 + $0x6c] ss:$16 sps:$4 sm:$0xff]   ;;  %v117_v14 = vpack.c.bf16 %v116_v9, %v116_v9 }
  0x52   :  { %249 = vmatpush1.bf16.msra.mxu1 %v1499_v2  ;;  %v1502_v4 = vld [vmem:[#allocation5 + $0x40] ss:$16 sps:$4 sm:$0xff]   ;;  %v1503_v5 = vld [vmem:[#allocation5 + $0x24] ss:$16 sps:$4 sm:$0xff]   ;;  %v1509_v15 = vld [vmem:[#allocation5 + $0x68] ss:$16 sps:$4 sm:$0xff]  }
  0x53   :  { %250 = vmatprep.subr.bf16.mxu1 %v1500_v3  ;;  %v1505_v6 = vld [vmem:[#allocation5 + $0x20] ss:$16 sps:$4 sm:$0xff]   ;;  %v1506_v7 = vld [vmem:[#allocation5 + $0x4] ss:$16 sps:$4 sm:$0xff]   ;;  %vm236_vm0 = vcmask 523264   ;;  %vm1883_vm1 = vmmov 0  }
  0x54   :  { %v1508_v8 = vld [vmem:[#allocation5] ss:$16 sps:$4 sm:$0xff]   ;;  %v1523_v12 = vld [vmem:[#allocation8 + $0x70] ss:$8 sps:$4 sm:$0xff]   ;;  %v1526_v16 = vld [vmem:[#allocation8 + $0x60] ss:$8 sps:$4 sm:$0xff]  }
  0x55   :  { %v1521_v11 = vld [vmem:[#allocation8 + $0x74] ss:$8 sps:$4 sm:$0xff]   ;;  %v1524_v13 = vld [vmem:[#allocation8 + $0x64] ss:$8 sps:$4 sm:$0xff]   ;;  %v1514_v17 = vld [vmem:[#allocation5 + $0x4c] ss:$16 sps:$4 sm:$0xff]  }
  0x56   :  { %251 = vmatpush1.bf16.msra.mxu1 %v1502_v4  ;;  %722 = vmatprep.subr.bf16.mxu0 %v1521_v11  ;;  %v1527_v18 = vld [vmem:[#allocation8 + $0x54] ss:$8 sps:$4 sm:$0xff]   ;;  %v1529_v20 = vld [vmem:[#allocation8 + $0x50] ss:$8 sps:$4 sm:$0xff]   ;;  %v1530_v21 = vld [vmem:[#allocation8 + $0x44] ss:$8 sps:$4 sm:$0xff]  }
  0x57   :  { %252 = vmatprep.subr.bf16.mxu1 %v1503_v5  ;;  %723 = vmatpush1.bf16.msra.mxu0 %v1523_v12  ;;  %v1512_v19 = vld [vmem:[#allocation5 + $0x48] ss:$16 sps:$4 sm:$0xff]   ;;  %v1517_v22 = vld [vmem:[#allocation5 + $0x2c] ss:$16 sps:$4 sm:$0xff]   ;;  %vm1248_vm2 = vcmask 818176   ;;  %s1885_s15 = smov [#allocation14]  }
  0x58   :  { %724 = vmatprep.subr.bf16.mxu0 %v1524_v13  ;;  %v1532_v23 = vld [vmem:[#allocation8 + $0x40] ss:$8 sps:$4 sm:$0xff]   ;;  %v1515_v24 = vld [vmem:[#allocation5 + $0x28] ss:$16 sps:$4 sm:$0xff]   ;;  %v1538_v28 = vld [vmem:[#allocation8 + $0x30] ss:$8 sps:$4 sm:$0xff]  }
  0x59   :  { %v1533_v25 = vld [vmem:[#allocation8 + $0x34] ss:$8 sps:$4 sm:$0xff]   ;;  %v1520_v26 = vld [vmem:[#allocation5 + $0xc] ss:$16 sps:$4 sm:$0xff]   ;;  %v1539_v29 = vld [vmem:[#allocation8 + $0x24] ss:$8 sps:$4 sm:$0xff]  }
  0x5a   :  { %253 = vmatpush1.bf16.msra.mxu1 %v1505_v6  ;;  %v1518_v27 = vld [vmem:[#allocation5 + $0x8] ss:$16 sps:$4 sm:$0xff]   ;;  %v1544_v31 = vld [vmem:[#allocation8 + $0x20] ss:$8 sps:$4 sm:$0xff]   ;;  %v1535_v32 = vld [vmem:[#allocation8 + $0x170] ss:$8 sps:$4 sm:$0xff]  }
  0x5b   :  { %254 = vmatprep.subr.bf16.mxu1 %v1506_v7  ;;  %725 = vmatpush1.bf16.msra.mxu0 %v1526_v16  ;;  %v1537_v30 = vld [vmem:[#allocation8 + $0x174] ss:$8 sps:$4 sm:$0xff]   ;;  %v1543_v34 = vld [vmem:[#allocation8 + $0x164] ss:$8 sps:$4 sm:$0xff]   ;;  %v1541_v35 = vld [vmem:[#allocation8 + $0x160] ss:$8 sps:$4 sm:$0xff]  }
  0x5c   :  { %726 = vmatprep.subr.bf16.mxu0 %v1527_v18  ;;  %v1545_v33 = vld [vmem:[#allocation8 + $0x14] ss:$8 sps:$4 sm:$0xff]   ;;  %v1550_v36 = vld [vmem:[#allocation8 + $0x10] ss:$8 sps:$4 sm:$0xff]   ;;  %v1551_v37 = vld [vmem:[#allocation8 + $0x4] ss:$8 sps:$4 sm:$0xff]  }
  0x5d   :  { %v1549_v38 = vld [vmem:[#allocation8 + $0x154] ss:$8 sps:$4 sm:$0xff]   ;;  %v1556_v39 = vld [vmem:[#allocation8] ss:$8 sps:$4 sm:$0xff]   ;;  %v1547_v40 = vld [vmem:[#allocation8 + $0x150] ss:$8 sps:$4 sm:$0xff]  }
  0x5e   :  { %255 = vmatpush1.bf16.msra.mxu1 %v1508_v8  ;;  %v1557_v41 = vld [vmem:[#allocation8 + $0xf4] ss:$8 sps:$4 sm:$0xff]   ;;  %v1555_v42 = vld [vmem:[#allocation8 + $0x144] ss:$8 sps:$4 sm:$0xff]   ;;  %v1553_v43 = vld [vmem:[#allocation8 + $0x140] ss:$8 sps:$4 sm:$0xff]  }
  0x5f   :  { %289 = vmatprep.subr.bf16.mxu1 %v1511_v10  ;;  %727 = vmatpush1.bf16.msra.mxu0 %v1529_v20  ;;  %v1561_v44 = vld [vmem:[#allocation8 + $0x134] ss:$8 sps:$4 sm:$0xff]   ;;  %v1562_v45 = vld [vmem:[#allocation8 + $0xf0] ss:$8 sps:$4 sm:$0xff]   ;;  %v1563_v46 = vld [vmem:[#allocation8 + $0xe4] ss:$8 sps:$4 sm:$0xff]  }
  0x60   :  { %728 = vmatprep.subr.bf16.mxu0 %v1530_v21  ;;  %v1568_v47 = vld [vmem:[#allocation8 + $0xe0] ss:$8 sps:$4 sm:$0xff]   ;;  %v1559_v48 = vld [vmem:[#allocation8 + $0x130] ss:$8 sps:$4 sm:$0xff]   ;;  %v1569_v49 = vld [vmem:[#allocation8 + $0xd4] ss:$8 sps:$4 sm:$0xff]   ;;  %v136_v21 = vlaneseq }
  0x61   :  { %1319 = vmatmul.mubr.msk.bf16.vlgmr.msra.gmra.mxu1 %vm236_vm0, %v117_v14  ;;  %v1567_v50 = vld [vmem:[#allocation8 + $0x124] ss:$8 sps:$4 sm:$0xff]   ;;  %v1574_v51 = vld [vmem:[#allocation8 + $0xd0] ss:$8 sps:$4 sm:$0xff]   ;;  %v1565_v52 = vld [vmem:[#allocation8 + $0x120] ss:$8 sps:$4 sm:$0xff]  }
  0x62   :  { %290 = vmatpush1.bf16.msra.mxu1 %v1509_v15  ;;  %313 = vmatprep.mubr.bf16.mxu1 %v1881_v0  ;;  %v1575_v53 = vld [vmem:[#allocation8 + $0xc4] ss:$8 sps:$4 sm:$0xff]   ;;  %v1573_v54 = vld [vmem:[#allocation8 + $0x114] ss:$8 sps:$4 sm:$0xff]   ;;  %v1580_v55 = vld [vmem:[#allocation8 + $0xc0] ss:$8 sps:$4 sm:$0xff]  }
  0x63   :  { %291 = vmatprep.subr.bf16.mxu1 %v1514_v17  ;;  %729 = vmatpush1.bf16.msra.mxu0 %v1532_v23  ;;  %v1571_v56 = vld [vmem:[#allocation8 + $0x110] ss:$8 sps:$4 sm:$0xff]   ;;  %v1581_v57 = vld [vmem:[#allocation8 + $0xb4] ss:$8 sps:$4 sm:$0xff]   ;;  %v1579_v58 = vld [vmem:[#allocation8 + $0x104] ss:$8 sps:$4 sm:$0xff]  }
  0x64   :  { %730 = vmatprep.subr.bf16.mxu0 %v1533_v25  ;;  %v1586_v59 = vld [vmem:[#allocation8 + $0xb0] ss:$8 sps:$4 sm:$0xff]   ;;  %v1577_v60 = vld [vmem:[#allocation8 + $0x100] ss:$8 sps:$4 sm:$0xff]   ;;  %v1587_v61 = vld [vmem:[#allocation8 + $0xa4] ss:$8 sps:$4 sm:$0xff]  }
  0x65   :  { %v1585_v62 = vld [vmem:[#allocation8 + $0x1f4] ss:$8 sps:$4 sm:$0xff]   ;;  %v1592_v63 = vld [vmem:[#allocation8 + $0xa0] ss:$8 sps:$4 sm:$0xff]   ;;  %v1583_v1 = vld [vmem:[#allocation8 + $0x1f0] ss:$8 sps:$4 sm:$0xff]  }
  0x66   :  { %292 = vmatpush1.bf16.msra.mxu1 %v1512_v19  ;;  %v1591_v2 = vld [vmem:[#allocation8 + $0x1e4] ss:$8 sps:$4 sm:$0xff]   ;;  %v1589_v3 = vld [vmem:[#allocation8 + $0x1e0] ss:$8 sps:$4 sm:$0xff]   ;;  %v1593_v4 = vld [vmem:[#allocation8 + $0x94] ss:$8 sps:$4 sm:$0xff]  }
  0x67   :  { %293 = vmatprep.subr.bf16.mxu1 %v1517_v22  ;;  %731 = vmatpush1.bf16.msra.mxu0 %v1538_v28  ;;  %v1597_v5 = vld [vmem:[#allocation8 + $0x1d4] ss:$8 sps:$4 sm:$0xff]   ;;  %v1595_v6 = vld [vmem:[#allocation8 + $0x1d0] ss:$8 sps:$4 sm:$0xff]   ;;  %v1599_v8 = vld [vmem:[#allocation8 + $0x84] ss:$8 sps:$4 sm:$0xff]  }
  0x68   :  { %732 = vmatprep.subr.bf16.mxu0 %v1539_v29  ;;  %v1598_v7 = vld [vmem:[#allocation8 + $0x90] ss:$8 sps:$4 sm:$0xff]   ;;  %v1603_v9 = vld [vmem:[#allocation8 + $0x1c4] ss:$8 sps:$4 sm:$0xff]   ;;  %v1601_v10 = vld [vmem:[#allocation8 + $0x1c0] ss:$8 sps:$4 sm:$0xff]  }
  0x69   :  { %v1604_v11 = vld [vmem:[#allocation8 + $0x80] ss:$8 sps:$4 sm:$0xff]   ;;  %v1607_v12 = vld [vmem:[#allocation8 + $0x1b4] ss:$8 sps:$4 sm:$0xff]   ;;  %v1605_v13 = vld [vmem:[#allocation8 + $0x1b0] ss:$8 sps:$4 sm:$0xff]  }
  0x6a   :  { %294 = vmatpush1.bf16.msra.mxu1 %v1515_v24  ;;  %v1608_v15 = vld [vmem:[#allocation8 + $0x1a0] ss:$8 sps:$4 sm:$0xff]   ;;  %v1613_v16 = vld [vmem:[#allocation8 + $0x194] ss:$8 sps:$4 sm:$0xff]   ;;  %v1611_v17 = vld [vmem:[#allocation8 + $0x190] ss:$8 sps:$4 sm:$0xff]  }
  0x6b   :  { %295 = vmatprep.subr.bf16.mxu1 %v1520_v26  ;;  %733 = vmatpush1.bf16.msra.mxu0 %v1544_v31  ;;  %v1616_v18 = vld [vmem:[#allocation8 + $0x184] ss:$8 sps:$4 sm:$0xff]   ;;  %v1614_v19 = vld [vmem:[#allocation8 + $0x180] ss:$8 sps:$4 sm:$0xff]   ;;  %v1617_v20 = vld [vmem:[#allocation10 + $0x78] sm:$0xff]   ;;  %v1969_v22 = vshrl.u32 %v136_v21, 7 }
  0x6c   :  { %734 = vmatprep.subr.bf16.mxu0 %v1545_v33  ;;  %v134_v24 = vld [vmem:[#allocation7] sm:$0xf]  ;;  %s1274_s16 = sshll.u32 %s1885_s15, 4  ;;  %s1886_s17 = smov [#allocation16]   ;;  %s1275_s16 = int_to_ptr.vmem [resolvable:$true] %s1274_s16 }
  0x6d   :  { %v1972_v23 = vsub.s32 0, %v1969_v22  ;;  %v1975_v25 = vsub.s32 1, %v1969_v22  ;;  %s1284_s18 = sshll.u32 %s1886_s17, 4  ;;  %s1285_s18 = int_to_ptr.vmem [resolvable:$true] %s1284_s18 }
  0x6e   :  { %296 = vmatpush1.bf16.msra.mxu1 %v1518_v27 }
  0x6f   :  { %763 = vmatprep.subr.bf16.mxu1 %v1537_v30  ;;  %735 = vmatpush1.bf16.msra.mxu0 %v1550_v36  ;;  %v139_v26 = vrot.slane %v134_v24, %v1972_v23  ;;  %v143_v27 = vrot.slane %v134_v24, %v1975_v25 }
  0x70   :  { %736 = vmatprep.subr.bf16.mxu0 %v1551_v37  ;;  %v1619_v37 = vld [vmem:[#allocation10 + $0x70] sm:$0xff]  }
  0x71   :  { %1320 = vmatmul.mubr.msk.bf16.vlgmr.msra.gmra.mxu1 %vm236_vm0, %v117_v14  ;;  %v1610_v14 = vld [vmem:[#allocation8 + $0x1a4] ss:$8 sps:$4 sm:$0xff]  }
  0x72   :  { %764 = vmatpush1.bf16.msra.mxu1 %v1535_v32 }
  0x73   :  { %765 = vmatprep.subr.bf16.mxu1 %v1543_v34  ;;  %737 = vmatpush1.bf16.msra.mxu0 %v1556_v39  ;;  %v1618_v34 = vld [vmem:[#allocation10 + $0x38] sm:$0xff]   ;;  %v146_v39 = vsub.s32 2, %v1969_v22 }
  0x74   :  { %738 = vmatprep.subr.bf16.mxu0 %v1557_v41 }
  0x75   :  { %v147_v41 = vrot.slane %v134_v24, %v146_v39 }
  0x76   :  { %766 = vmatpush1.bf16.msra.mxu1 %v1541_v35 }
  0x77   :  { %767 = vmatprep.subr.bf16.mxu1 %v1549_v38  ;;  %739 = vmatpush2.bf16.msra.mxu0 %v1562_v45  ;;  %v1620_v38 = vld [vmem:[#allocation10 + $0x30] sm:$0xff]  }
  0x78   :  { %740 = vmatprep.subr.bf16.mxu0 %v1563_v46 }
  0x7a   :  { %768 = vmatpush1.bf16.msra.mxu1 %v1547_v40  ;;  %v150_v40 = vsub.s32 3, %v1969_v22 }
  0x7b   :  { %769 = vmatprep.subr.bf16.mxu1 %v1555_v42  ;;  %741 = vmatpush2.bf16.msra.mxu0 %v1568_v47 }
  0x7c   :  { %742 = vmatprep.subr.bf16.mxu0 %v1569_v49  ;;  %v151_v42 = vrot.slane %v134_v24, %v150_v40  ;;  %v1656_v40 = vld [vmem:[#allocation11 + $0x38] ss:$12 sps:$4 sm:$0xff]  }
  0x7e   :  { %770 = vmatpush1.bf16.msra.mxu1 %v1553_v43 }
  0x7f   :  { %771 = vmatprep.subr.bf16.mxu1 %v1561_v44  ;;  %743 = vmatpush2.bf16.msra.mxu0 %v1574_v51  ;;  %v1621_v51 = vld [vmem:[#allocation10 + $0x68] sm:$0xff]  }
  0x80   :  { %744 = vmatprep.subr.bf16.mxu0 %v1575_v53  ;;  %v1623_v53 = vld [vmem:[#allocation10 + $0x60] sm:$0xff]  }
  0x82   :  { %772 = vmatpush1.bf16.msra.mxu1 %v1559_v48 }
  0x83   :  { %773 = vmatprep.subr.bf16.mxu1 %v1567_v50  ;;  %745 = vmatpush2.bf16.msra.mxu0 %v1580_v55  ;;  %v1625_v55 = vld [vmem:[#allocation10 + $0x58] sm:$0xff]  }
  0x84   :  { %746 = vmatprep.subr.bf16.mxu0 %v1581_v57  ;;  %v1627_v57 = vld [vmem:[#allocation10 + $0x50] sm:$0xff]  }
  0x86   :  { %774 = vmatpush1.bf16.msra.mxu1 %v1565_v52  ;;  %v1622_v52 = vld [vmem:[#allocation10 + $0x28] sm:$0xff]  }
  0x87   :  { %775 = vmatprep.subr.bf16.mxu1 %v1573_v54  ;;  %747 = vmatpush2.bf16.msra.mxu0 %v1586_v59  ;;  %v1624_v54 = vld [vmem:[#allocation10 + $0x20] sm:$0xff]   ;;  %v1629_v59 = vld [vmem:[#allocation10 + $0x48] sm:$0xff]  }
  0x88   :  { %748 = vmatprep.subr.bf16.mxu0 %v1587_v61  ;;  %v1632_v61 = vld [vmem:[#allocation10] sm:$0xff]  }
  0x8a   :  { %776 = vmatpush1.bf16.msra.mxu1 %v1571_v56  ;;  %v1626_v56 = vld [vmem:[#allocation10 + $0x18] sm:$0xff]  }
  0x8b   :  { %777 = vmatprep.subr.bf16.mxu1 %v1579_v58  ;;  %749 = vmatpush2.bf16.msra.mxu0 %v1592_v63  ;;  %v1628_v58 = vld [vmem:[#allocation10 + $0x10] sm:$0xff]   ;;  %v1635_v63 = vld [vmem:[#allocation11 + $0xac] ss:$12 sps:$4 sm:$0xff]  }
  0x8c   :  { %750 = vmatprep.subr.bf16.mxu0 %v1593_v4  ;;  %v1643_v4 = vld [vmem:[#allocation11 + $0x7c] ss:$12 sps:$4 sm:$0xff]  }
  0x8e   :  { %778 = vmatpush1.bf16.msra.mxu1 %v1577_v60  ;;  %v1630_v60 = vld [vmem:[#allocation10 + $0x8] sm:$0xff]  }
  0x8f   :  { %779 = vmatprep.subr.bf16.mxu1 %v1585_v62  ;;  %751 = vmatpush2.bf16.msra.mxu0 %v1598_v7  ;;  %v1633_v62 = vld [vmem:[#allocation11 + $0xa8] ss:$12 sps:$4 sm:$0xff]   ;;  %v1645_v7 = vld [vmem:[#allocation11 + $0x60] ss:$12 sps:$4 sm:$0xff]  }
  0x90   :  { %752 = vmatprep.subr.bf16.mxu0 %v1599_v8  ;;  %v1651_v8 = vld [vmem:[#allocation11 + $0x4c] ss:$12 sps:$4 sm:$0xff]  }
  0x92   :  { %780 = vmatpush2.bf16.msra.mxu1 %v1583_v1  ;;  %v1882_v1 = vmov 0.0  }
  0x93   :  { %781 = vmatprep.subr.bf16.mxu1 %v1591_v2  ;;  %753 = vmatpush2.bf16.msra.mxu0 %v1604_v11  ;;  %v1639_v2 = vld [vmem:[#allocation11 + $0x94] ss:$12 sps:$4 sm:$0xff]   ;;  %v1653_v11 = vld [vmem:[#allocation11 + $0x30] ss:$12 sps:$4 sm:$0xff]  }
  0x94   :  { %1426 = vmatprep.subr.bf16.mxu0 %v1617_v20 }
  0x96   :  { %782 = vmatpush2.bf16.msra.mxu1 %v1589_v3  ;;  %v1637_v3 = vld [vmem:[#allocation11 + $0x90] ss:$12 sps:$4 sm:$0xff]  }
  0x97   :  { %783 = vmatprep.subr.bf16.mxu1 %v1597_v5  ;;  %v1641_v5 = vld [vmem:[#allocation11 + $0x78] ss:$12 sps:$4 sm:$0xff]  }
  0x9a   :  { %784 = vmatpush2.bf16.msra.mxu1 %v1595_v6  ;;  %v1647_v6 = vld [vmem:[#allocation11 + $0x64] ss:$12 sps:$4 sm:$0xff]  }
  0x9b   :  { %785 = vmatprep.subr.bf16.mxu1 %v1603_v9  ;;  %v1649_v9 = vld [vmem:[#allocation11 + $0x48] ss:$12 sps:$4 sm:$0xff]  }
  0x9e   :  { %786 = vmatpush2.bf16.msra.mxu1 %v1601_v10  ;;  %v1655_v10 = vld [vmem:[#allocation11 + $0x34] ss:$12 sps:$4 sm:$0xff]  }
  0x9f   :  { %787 = vmatprep.subr.bf16.mxu1 %v1607_v12 }
  0xa2   :  { %788 = vmatpush2.bf16.msra.mxu1 %v1605_v13 }
  0xa3   :  { %789 = vmatprep.subr.bf16.mxu1 %v1610_v14 }
  0xa6   :  { %790 = vmatpush2.bf16.msra.mxu1 %v1608_v15 }
  0xa7   :  { %791 = vmatprep.subr.bf16.mxu1 %v1613_v16  ;;  %v390_v16 = vld [vmem:[%s2024_s4] sm:$0x3] }
  0xaa   :  { %792 = vmatpush2.bf16.msra.mxu1 %v1611_v17  ;;  %v395_v17 = vrot.slane %v390_v16, %v1972_v23 }
  0xab   :  { %793 = vmatprep.subr.bf16.mxu1 %v1616_v18  ;;  %v399_v18 = vrot.slane %v390_v16, %v1975_v25 }
  0xae   :  { %794 = vmatpush2.bf16.msra.mxu1 %v1614_v19 }
  0xaf   :  { %1162 = vmatprep.subr.bf16.mxu1 %v1635_v63 }
 0x121   :  { %v274_v28 = vpop.f32.mrf.mxu1 }
 0x122   :  { %v275_v29 = vadd.f32 %v274_v28, %v139_v26 }
 0x123   :  { %v276_v30 = vpop.f32.mrf.mxu1 }
 0x124   :  { %v277_v31 = vadd.f32 %v276_v30, %v143_v27  ;;  %v322_v35 = vpack.c.bf16 %v275_v29, %v275_v29 }
 0x125   :  { %v278_v32 = vpop.f32.mrf.mxu1 }
 0x126   :  { %v323_v33 = vpack.c.bf16 %v277_v31, %v277_v31 }
 0x127   :  { %v279_v36 = vpop.f32.mrf.mxu1 }
 0x128   :  { %754 = vmatprep.mubr.bf16.mxu0 %v323_v33  ;;  %v1636_v33 = vld [vmem:[#allocation11 + $0xb0] ss:$12 sps:$4 sm:$0xff]   ;;  %v1644_v36 = vld [vmem:[#allocation11 + $0x80] ss:$12 sps:$4 sm:$0xff]  }
 0x129   :  { %755 = vmatmul.mubr.bf16.vlgmr.msra.gmra.mxu0 %v322_v35  ;;  %v1640_v35 = vld [vmem:[#allocation11 + $0x98] ss:$12 sps:$4 sm:$0xff]  }
 0x12a   :  { %1427 = vmatpush3.bf16.msra.mxu0 %v1618_v34 }
 0x12b   :  { %1428 = vmatprep.subr.bf16.mxu0 %v1619_v37  ;;  %v1648_v37 = vld [vmem:[#allocation11 + $0x68] ss:$12 sps:$4 sm:$0xff]  }
 0x12e   :  { %1429 = vmatpush3.bf16.msra.mxu0 %v1620_v38  ;;  %v1652_v38 = vld [vmem:[#allocation11 + $0x50] ss:$12 sps:$4 sm:$0xff]  }
 0x12f   :  { %1430 = vmatprep.subr.bf16.mxu0 %v1621_v51 }
 0x131   :  { %v315_v43 = vpop.f32.mrf.mxu1 }
 0x132   :  { %v316_v44 = vadd.f32 %v315_v43, %v147_v41  ;;  %1431 = vmatpush3.bf16.msra.mxu0 %v1622_v52  ;;  %v1659_v41 = vld [vmem:[#allocation11 + $0x1c] ss:$12 sps:$4 sm:$0xff]   ;;  %v1660_v43 = vld [vmem:[#allocation11 + $0x20] ss:$12 sps:$4 sm:$0xff]  }
 0x133   :  { %v317_v45 = vpop.f32.mrf.mxu1  ;;  %1432 = vmatprep.subr.bf16.mxu0 %v1623_v53 }
 0x134   :  { %v318_v46 = vadd.f32 %v317_v45, %v151_v42  ;;  %v324_v49 = vpack.c.bf16 %v316_v44, %v316_v44  ;;  %v1657_v42 = vld [vmem:[#allocation11 + $0x18] ss:$12 sps:$4 sm:$0xff]   ;;  %v1661_v45 = vld [vmem:[#allocation11] ss:$12 sps:$4 sm:$0xff]  }
 0x135   :  { %v319_v47 = vpop.f32.mrf.mxu1  ;;  %v1663_v44 = vld [vmem:[#allocation11 + $0x4] ss:$12 sps:$4 sm:$0xff]  }
 0x136   :  { %v325_v48 = vpack.c.bf16 %v318_v46, %v318_v46  ;;  %1433 = vmatpush3.bf16.msra.mxu0 %v1624_v54  ;;  %v1664_v46 = vld [vmem:[#allocation11 + $0x8] ss:$12 sps:$4 sm:$0xff]  }
 0x137   :  { %v320_v50 = vpop.f32.mrf.mxu1  ;;  %1434 = vmatprep.subr.bf16.mxu0 %v1625_v55 }
 0x138   :  { %795 = vmatprep.mubr.bf16.mxu1 %v325_v48  ;;  %v1385_v48 = vld [vmem:[%s2026_s6] ss:$0 sm:$0xff]  ;;  %s1884_s6 = smov [#allocation13]  }
 0x139   :  { %796 = vmatmul.mubr.bf16.vlgmr.msra.gmra.mxu1 %v324_v49 }
 0x13a   :  { %1194 = vmatprep.mubr.bf16.mxu1 %v1881_v0  ;;  %1435 = vmatpush3.bf16.msra.mxu0 %v1626_v56  ;;  %v1631_v0 = vld [vmem:[#allocation10 + $0x40] sm:$0xff]   ;;  %v1017_v56 = vld [vmem:[%s2028_s8] sm:$0x7]  ;;  %s1264_s8 = sshll.u32 %s1884_s6, 4  ;;  %s1265_s8 = int_to_ptr.vmem [resolvable:$true] %s1264_s8 }
 0x13b   :  { %1436 = vmatprep.subr.bf16.mxu0 %v1627_v57  ;;  %1163 = vmatpush1.bf16.msra.mxu1 %v1633_v62  ;;  %v1022_v57 = vrot.slane %v1017_v56, %v1972_v23  ;;  %s1795_s3 = scalar_lea.vmem %s1265_s8, 128  ;;  %p1800_p3 = scmp.lt.s32.totalorder %s1265_s8, %s1265_s8 }
 0x13c   :  { %1164 = vmatprep.subr.bf16.mxu1 %v1639_v2  ;;  %p1796_p2 = scmp.ne.s32.totalorder %s1265_s8, %s1795_s3  ;;  %p1801_p4 = scmp.lt.s32.totalorder %s1795_s3, %s1795_s3 }
 0x13e   :  { %1437 = vmatpush3.bf16.msra.mxu0 %v1628_v58  ;;  %v1030_v58 = vrot.slane %v1017_v56, %v146_v39  ;;  %p1802_p5 = por %p1801_p4, %p1800_p3 }
 0x13f   :  { %1438 = vmatprep.subr.bf16.mxu0 %v1629_v59  ;;  %1165 = vmatpush1.bf16.msra.mxu1 %v1637_v3  ;;  %v1026_v59 = vrot.slane %v1017_v56, %v1975_v25 }
 0x140   :  { %1166 = vmatprep.subr.bf16.mxu1 %v1643_v4  ;;  %p1803_p6 = pnand %p1802_p5, %p1796_p2 }
 0x142   :  { %1439 = vmatpush3.bf16.msra.mxu0 %v1630_v60 }
 0x143   :  { %1440 = vmatprep.subr.bf16.mxu0 %v1631_v0  ;;  %1167 = vmatpush1.bf16.msra.mxu1 %v1641_v5 }
 0x144   :  { %1168 = vmatprep.subr.bf16.mxu1 %v1647_v6 }
 0x146   :  { %1441 = vmatpush3.bf16.msra.mxu0 %v1632_v61 }
 0x147   :  { %1457 = vmatprep.subr.bf16.mxu0 %v1882_v1  ;;  %1169 = vmatpush1.bf16.msra.mxu1 %v1645_v7 }
 0x148   :  { %1170 = vmatprep.subr.bf16.mxu1 %v1651_v8 }
 0x14b   :  { %1171 = vmatpush1.bf16.msra.mxu1 %v1649_v9 }
 0x14c   :  { %1172 = vmatprep.subr.bf16.mxu1 %v1655_v10 }
 0x14f   :  { %1173 = vmatpush1.bf16.msra.mxu1 %v1653_v11 }
 0x150   :  { %1174 = vmatprep.subr.bf16.mxu1 %v1659_v41 }
 0x153   :  { %1175 = vmatpush1.bf16.msra.mxu1 %v1657_v42 }
 0x154   :  { %1176 = vmatprep.subr.bf16.mxu1 %v1663_v44 }
 0x157   :  { %1177 = vmatpush1.bf16.msra.mxu1 %v1661_v45 }
 0x1e9   :  { %v756_v12 = vpop.f32.mrf.mxu0 }
 0x1ea   :  { %v757_v19 = vadd.f32 %v756_v12, %v395_v17 }
 0x1eb   :  { %v758_v13 = vpop.f32.mrf.mxu0 }
 0x1ec   :  { %v759_v21 = vadd.f32 %v758_v13, %v399_v18 }
 0x1ed   :  { %v760_v14 = vpop.f32.mrf.mxu0 }
 0x1ef   :  { %v761_v15 = vpop.f32.mrf.mxu0 }
 0x1f9   :  { %v797_v20 = vpop.f32.mrf.mxu1 }
 0x1fa   :  { %v798_v24 = vadd.f32 %v797_v20, %v757_v19 }
 0x1fb   :  { %v799_v26 = vpop.f32.mrf.mxu1 }
 0x1fc   :  { %v800_v27 = vadd.f32 %v799_v26, %v759_v21  ;;  %v804_v28 = vmax.f32 %v798_v24, 0.0 }
 0x1fd   :  { %v801_v29 = vpop.f32.mrf.mxu1 }
 0x1fe   :  { %v805_v30 = vmax.f32 %v800_v27, 0.0  ;;  %v806_v34 = vpack.c.bf16 %v804_v28, %v804_v28 }
 0x1ff   :  { %v802_v31 = vpop.f32.mrf.mxu1 }
 0x200   :  { %v807_v32 = vpack.c.bf16 %v805_v30, %v805_v30 }
 0x202   :  { %975 = vmatprep.mubr.bf16.mxu0 %v807_v32 }
 0x203   :  { %976 = vmatmul.mubr.bf16.vlgmr.msra.gmra.mxu0 %v806_v34 }
 0x204   :  { %1458 = vmatpush3.bf16.msra.mxu0 %v1636_v33  ;;  %1473 = vmatprep.mubr.msk.bf16.mxu0 %vm1883_vm1, %v1882_v1 }
 0x205   :  { %1459 = vmatprep.subr.bf16.mxu0 %v1882_v1 }
 0x208   :  { %1460 = vmatpush3.bf16.msra.mxu0 %v1640_v35 }
 0x209   :  { %1461 = vmatprep.subr.bf16.mxu0 %v1882_v1 }
 0x20c   :  { %1462 = vmatpush3.bf16.msra.mxu0 %v1644_v36 }
 0x20d   :  { %1463 = vmatprep.subr.bf16.mxu0 %v1882_v1 }
 0x210   :  { %1464 = vmatpush3.bf16.msra.mxu0 %v1648_v37 }
 0x211   :  { %1465 = vmatprep.subr.bf16.mxu0 %v1882_v1 }
 0x214   :  { %1466 = vmatpush3.bf16.msra.mxu0 %v1652_v38 }
 0x215   :  { %1467 = vmatprep.subr.bf16.mxu0 %v1882_v1 }
 0x218   :  { %1468 = vmatpush3.bf16.msra.mxu0 %v1656_v40 }
 0x219   :  { %1469 = vmatprep.subr.bf16.mxu0 %v1882_v1 }
 0x21c   :  { %1470 = vmatpush3.bf16.msra.mxu0 %v1660_v43 }
 0x21d   :  { %1471 = vmatprep.subr.bf16.mxu0 %v1882_v1 }
 0x220   :  { %1472 = vmatpush3.bf16.msra.mxu0 %v1664_v46 }
 0x2c3   :  { %v1442_v47 = vpop.f32.mrf.mxu0 }
 0x2c5   :  { %v1443_v49 = vpop.f32.mrf.mxu0 }
 0x2c6   :  { %v1444_v50 = vadd.f32 %v1443_v49, %v1442_v47 }
 0x2c7   :  { %v1445_v51 = vpop.f32.mrf.mxu0 }
 0x2c8   :  { %v978_v52 = vadd.f32 %v1444_v50, %v1385_v48 }
 0x2c9   :  { %v1446_v53 = vpop.f32.mrf.mxu0 }
 0x2ca   :  { %v983_v54 = vmax.f32 %v978_v52, 0.0 }
 0x2cc   :  { %v984_v55 = vpack.c.bf16 %v983_v54, %v983_v54 }
 0x2ce   :  { %1195 = vmatmul.mubr.bf16.vlgmr.msra.gmra.mxu1 %v984_v55  ;;  %1474 = vmatmul.mubr.bf16.vlgmr.msra.gmra.mxu0 %v984_v55 }
 0x38e   :  { %v1196_v60 = vpop.f32.mrf.mxu1  ;;  %v1237_v0 = vpop.f32.mrf.mxu0 }
 0x38f   :  { %v1197_v61 = vadd.f32 %v1196_v60, %v1022_v57  ;;  %v1238_v62 = vadd.f32 %v1237_v0, %v1030_v58 }
 0x390   :  { %v1198_v63 = vpop.f32.mrf.mxu1  ;;  %v1475_v1 = vpop.f32.mrf.mxu0 }
 0x391   :  { %v1243_v2 = vsub.f32 0.0, %v1197_v61  ;;  %1665 = vtanh.f32 %v1238_v62  ;;  %v1199_v3 = vadd.f32 %v1198_v63, %v1026_v59 }
 0x392   :  { %v1200_v4 = vpop.f32.mrf.mxu1  ;;  %v1240_v5 = vpop.f32.mrf.mxu0 }
 0x393   :  { %v1244_v6 = vmul.f32 1.442695, %v1243_v2  ;;  %v1250_v7 = vsub.f32 0.0, %v1199_v3 }
 0x394   :  { %v1201_v8 = vpop.f32.mrf.mxu1  ;;  %v1476_v23 = vpop.f32.mrf.mxu0 }
 0x395   :  { %1667 = vpow2.f32 %v1244_v6  ;;  %v1251_v22 = vmul.f32 1.442695, %v1250_v7 }
 0x397   :  { %1669 = vpow2.f32 %v1251_v22 }
 0x39e   :  { %v1666_v25 = vpop.eup %1665 }
 0x39f   :  { %1257 = vst.msk [vmem:[#allocation16] sm:$0xff] %vm1248_vm2, %v1666_v25 }
 0x3a2   :  { %v1668_v39 = vpop.eup %1667 }
 0x3a3   :  { %v1246_v9 = vadd.f32 1.0, %v1668_v39 }
 0x3a4   :  { %v1670_v10 = vpop.eup %1669 }
 0x3a5   :  { %1671 = vrcp.f32 %v1246_v9  ;;  %v1253_v11 = vadd.f32 1.0, %v1670_v10 }
 0x3a7   :  { %1673 = vrcp.f32 %v1253_v11 }
 0x3b2   :  { %v1672_v12 = vpop.eup %1671 }
 0x3b3   :  { %1249 = vst.msk [vmem:[#allocation13] sm:$0xff] %vm1248_vm2, %v1672_v12 }
 0x3b4   :  { %v1674_v13 = vpop.eup %1673 }
 0x3b5   :  { %1806 = shalt.err (!%p1803_p6)
}
 0x3b6   :  { %1267 = dma.vmem_to_hbm [thread:$0]  %s1265_s8, 128, %s2029_s9, [#allocation4]   ;;  %1255 = vst.msk [vmem:[#allocation14] sm:$0xff] %vm1248_vm2, %v1674_v13 }
 0x3b7   :  { %s1815_s21 = scalar_lea.vmem %s1275_s16, 128  ;;  %p1820_p8 = scmp.lt.s32.totalorder %s1275_s16, %s1275_s16 }
 0x3b8   :  { %p1816_p7 = scmp.ne.s32.totalorder %s1275_s16, %s1815_s21  ;;  %p1821_p9 = scmp.lt.s32.totalorder %s1815_s21, %s1815_s21 }
 0x3ba   :  { %p1822_p10 = por %p1821_p9, %p1820_p8 }
 0x3bc   :  { %p1823_p11 = pnand %p1822_p10, %p1816_p7 }
 0x3be   :  { %1826 = shalt.err (!%p1823_p11)
}
 0x3bf   :  { %1277 = dma.vmem_to_hbm [thread:$0]  %s1275_s16, 128, %s2030_s10, [#allocation15]  }
 0x3c0   :  { %s1835_s23 = scalar_lea.vmem %s1285_s18, 128  ;;  %p1840_p13 = scmp.lt.s32.totalorder %s1285_s18, %s1285_s18 }
 0x3c1   :  { %p1836_p12 = scmp.ne.s32.totalorder %s1285_s18, %s1835_s23  ;;  %p1841_p0 = scmp.lt.s32.totalorder %s1835_s23, %s1835_s23 }
 0x3c3   :  { %p1842_p1 = por %p1841_p0, %p1840_p13 }
 0x3c5   :  { %p1843_p2 = pnand %p1842_p1, %p1836_p12 }
 0x3c7   :  { %1846 = shalt.err (!%p1843_p2)
}
 0x3c8   :  { %1287 = dma.vmem_to_hbm [thread:$0]  %s1285_s18, 128, %s2031_s11, [#allocation15]  }
 0x3c9   :  { %1863 = dma.done.wait [#allocation4], 128  }
 0x3ca   :  { %1864 = vsyncadd [#allocation4], 4294967168 }
 0x3cb   :  { %1865 = dma.done.wait [#allocation15], 256  }
 0x3cc   :  { %1866 = vsyncadd [#allocation15], 4294967040 }
 0x3cd   :  { %1297 = vsyncpa [#allocation3], 1 }
 0x3ce   :  { %1298 = vsyncpa [#allocation6], 1 }
 0x3cf   :  { %1299 = vsyncpa [#allocation9], 1 }
 0x3d0   :  { %1300 = vsyncpa [#allocation12], 1 }
 0x3d1   :  { %1301 = vsyncpa [#allocation4], 1 }
 0x3d2   :  { %1302 = vsyncpa [#allocation15], 1 }

</bundles_post_ra>
